<compile_context>
chip_gen: v5e
topology: v5e:2x2
jax: 0.10.0
libtpu: 0.0.40
codegen_flags: <defaults>
</compile_context>

<pallas_src>
import functools

import jax
import jax.numpy as jnp
from jax import lax
from jax.experimental import pallas as pl
from jax.experimental.pallas import tpu as pltpu


def _pick_chunk(n_lanes, bt, target_elems=16384):
    """Largest lane chunk that (a) divides n_lanes, (b) is a multiple of 128,
    and (c) keeps the per-iteration working set (bt*chunk elems) vreg-friendly."""
    max_c = max(128, target_elems // max(bt, 1))
    if n_lanes <= max_c:
        return n_lanes
    max_c = (max_c // 128) * 128
    for c in range(max_c, 127, -128):
        if n_lanes % c == 0:
            return c
    return n_lanes  # n_lanes not a multiple of 128: fall back to whole rows


def _tongdao_kernel(x_ref, wb_ref, o_ref, *, n_chunks, chunk, unroll):
    # x_ref : (Bt, N) input block (lane-dense flattened C*H*W)
    # wb_ref: (1, N)  f32 per-lane weight = w[channel] / HW  (mean folded in)
    # o_ref : (Bt, N) output block
    bt = x_ref.shape[0]

    # Pass 1: per-row weighted sum, accumulated in f32 (robust for bf16 inputs).
    def reduce_body(i, acc):
        off = pl.multiple_of(i * chunk, chunk)
        xc = x_ref[:, pl.ds(off, chunk)].astype(jnp.float32)   # (Bt, chunk)
        wc = wb_ref[:, pl.ds(off, chunk)]                      # (1, chunk)
        return acc + jnp.sum(xc * wc, axis=-1, keepdims=True)

    s = lax.fori_loop(0, n_chunks, reduce_body,
                      jnp.zeros((bt, 1), jnp.float32), unroll=unroll)
    s = jnp.maximum(s, 0.0)                                    # ReLU on per-batch scalar
    s = s.astype(o_ref.dtype)

    # Hoist the broadcast of s out of the store loop when it stays small;
    # otherwise let the multiply broadcast (still emitted once in the loop body).
    if bt * chunk <= 32768:
        s = jnp.broadcast_to(s, (bt, chunk))

    # Pass 2: scale and store.  Re-reads x from VMEM (cheap: 3 vld slots/cycle)
    # instead of keeping the whole tile live in vregs across both passes.
    def scale_body(i, carry):
        off = pl.multiple_of(i * chunk, chunk)
        o_ref[:, pl.ds(off, chunk)] = x_ref[:, pl.ds(off, chunk)] * s
        return carry

    lax.fori_loop(0, n_chunks, scale_body, 0, unroll=unroll)


def tongdao_forward(x, w, *, block_bytes=2 * 1024 * 1024):
    """x: (B, C, H, W), w: (C,) fc weight (Conv2d(C,1,1,bias=False) squeezed)."""
    B, C, H, W = x.shape
    HW = H * W
    N = C * HW
    x_flat = x.reshape(B, N)

    # Fold the 1/HW mean and pre-broadcast the per-channel weight over the
    # flattened (channel-major) lane axis: wb[c*HW + p] = w[c] / HW.
    wb = (jnp.repeat(w.astype(jnp.float32), HW) * (1.0 / HW)).reshape(1, N)

    # Batch-block size: biggest slab up to ~block_bytes per buffer.
    itemsize = jnp.dtype(x.dtype).itemsize
    row_bytes = N * itemsize
    if B * row_bytes <= block_bytes:
        bt = B                              # whole batch in one grid step
    else:
        bt = max(1, block_bytes // row_bytes)
        if bt >= 8:
            bt = (bt // 8) * 8              # keep the sublane dim 8-aligned
        bt = min(bt, B)
    # NOTE: if a single row (C*H*W) ever exceeds the VMEM budget (bt == 1 with
    # row_bytes >> block_bytes), switch to a two-pass structure: a small
    # reduction kernel producing s[B], then an elementwise-scale kernel tiled
    # over (B, HW_tiles) with s passed via scalar prefetch.
    grid = (pl.cdiv(B, bt),)

    chunk = _pick_chunk(N, bt)
    n_chunks = N // chunk
    unroll = n_chunks <= 8

    kernel = functools.partial(_tongdao_kernel,
                               n_chunks=n_chunks, chunk=chunk, unroll=unroll)

    out_flat = pl.pallas_call(
        kernel,
        out_shape=jax.ShapeDtypeStruct((B, N), x.dtype),
        grid_spec=pltpu.PrefetchScalarGridSpec(
            num_scalar_prefetch=0,
            grid=grid,
            in_specs=[
                pl.BlockSpec((bt, N), lambda b: (b, 0)),   # x batch block
                pl.BlockSpec((1, N), lambda b: (0, 0)),    # folded weight (resident)
            ],
            out_specs=pl.BlockSpec((bt, N), lambda b: (b, 0)),
        ),
        compiler_params=pltpu.CompilerParams(
            dimension_semantics=("parallel",),
            # 2x double-buffered (in + out) blocks + weight ~= 4*block_bytes + 8*N;
            # 32 MiB leaves ample headroom yet fits every generation (v7x: 64 MiB).
            vmem_limit_bytes=32 * 1024 * 1024,
        ),
    )(x_flat, wb)

    return out_flat.reshape(B, C, H, W)


def _reference(x, w):
    # Pure-JAX reference of the PyTorch forward.
    y = jnp.mean(x, axis=(2, 3), keepdims=True)                      # (B, C, 1, 1)
    y = jnp.sum(y * w.reshape(1, -1, 1, 1), axis=1, keepdims=True)   # (B, 1, 1, 1)
    y = jnp.maximum(y, 0.0)
    return x * y                                                      # broadcast over C, H, W


if __name__ == "__main__":
    key = jax.random.PRNGKey(0)
    kx, kw = jax.random.split(key)

    B, C, H, W = 2, 4, 16, 16
    x = jax.random.normal(kx, (B, C, H, W), dtype=jnp.float32)

    # Conv2d(C, 1, 1, bias=False) weight, PyTorch-default-like init: U(-1/sqrt(C), 1/sqrt(C)).
    bound = 1.0 / (C ** 0.5)
    w = jax.random.uniform(kw, (C,), dtype=jnp.float32, minval=-bound, maxval=bound)

    out = tongdao_forward(x, w)
    jax.block_until_ready(out)

    ref = _reference(x, w)
    assert out.shape == (B, C, H, W)
    assert jnp.allclose(out, ref, atol=1e-5, rtol=1e-5), "mismatch vs reference"

    print("KERNEL_OK")
</pallas_src>

<mosaic_0001>
module attributes {stable_mosaic.version = 11 : i64} {
  func.func @_tongdao_kernel(%arg0: i32, %arg1: memref<2x1024xf32, #tpu.memory_space<vmem>>, %arg2: memref<1x1024xf32, #tpu.memory_space<vmem>>, %arg3: memref<2x1024xf32, #tpu.memory_space<vmem>>) attributes {dimension_semantics = [#tpu.dimension_semantics<parallel>], iteration_bounds = array<i64: 1>, scalar_prefetch = 0 : i64, scratch_operands = 0 : i64, tpu.core_type = #tpu.core_type<tc>, window_params = [{transform_indices = @transform_0, window_bounds = array<i64: 2, 1024>}, {pipeline_mode = #tpu.pipeline_mode<synchronous>, transform_indices = @transform_1, window_bounds = array<i64: 1, 1024>}, {transform_indices = @transform_2, window_bounds = array<i64: 2, 1024>}]} {
    %cst = arith.constant 0.000000e+00 : f32
    %0 = vector.broadcast %cst : f32 to vector<2x1xf32>
    %c0_i32 = arith.constant 0 : i32
    %c1024_i32 = arith.constant 1024 : i32
    %1 = arith.muli %c0_i32, %c1024_i32 : i32
    %2 = tpu.assume_multiple %1, 1024 : i32
    %c0 = arith.constant 0 : index
    %3 = arith.index_cast %2 : i32 to index
    %4 = vector.load %arg1[%c0, %3] : memref<2x1024xf32, #tpu.memory_space<vmem>>, vector<2x1024xf32>
    %c0_0 = arith.constant 0 : index
    %5 = arith.index_cast %2 : i32 to index
    %6 = vector.load %arg2[%c0_0, %5] : memref<1x1024xf32, #tpu.memory_space<vmem>>, vector<1x1024xf32>
    %7 = vector.broadcast %6 : vector<1x1024xf32> to vector<2x1024xf32>
    %8 = arith.mulf %4, %7 : vector<2x1024xf32>
    %cst_1 = arith.constant dense<0.000000e+00> : vector<2xf32>
    %9 = vector.multi_reduction <add>, %8, %cst_1 [1] : vector<2x1024xf32> to vector<2xf32>
    %10 = vector.shape_cast %9 : vector<2xf32> to vector<2x1xf32>
    %11 = arith.addf %0, %10 : vector<2x1xf32>
    %c1_i32 = arith.constant 1 : i32
    %cst_2 = arith.constant 0.000000e+00 : f32
    %12 = vector.broadcast %cst_2 : f32 to vector<2x1xf32>
    %13 = arith.maximumf %11, %12 : vector<2x1xf32>
    %14 = vector.shape_cast %13 : vector<2x1xf32> to vector<2x1xf32>
    %15 = vector.broadcast %14 : vector<2x1xf32> to vector<2x1024xf32>
    %c0_i32_3 = arith.constant 0 : i32
    %c1024_i32_4 = arith.constant 1024 : i32
    %16 = arith.muli %c0_i32_3, %c1024_i32_4 : i32
    %17 = tpu.assume_multiple %16, 1024 : i32
    %c0_5 = arith.constant 0 : index
    %18 = arith.index_cast %17 : i32 to index
    %19 = vector.load %arg1[%c0_5, %18] : memref<2x1024xf32, #tpu.memory_space<vmem>>, vector<2x1024xf32>
    %20 = arith.mulf %19, %15 : vector<2x1024xf32>
    %c0_6 = arith.constant 0 : index
    %21 = arith.index_cast %17 : i32 to index
    %22 = vector.load %arg3[%c0_6, %21] : memref<2x1024xf32, #tpu.memory_space<vmem>>, vector<2x1024xf32>
    tpu.vector_store %arg3[%c0_6, %21], %20 {strides = array<i32>} : memref<2x1024xf32, #tpu.memory_space<vmem>>, vector<2x1024xf32>,
    %c1_i32_7 = arith.constant 1 : i32
    return
  }
  func.func @transform_0(%arg0: i32) -> (i32, i32) {
    %c0_i32 = arith.constant 0 : i32
    %c0_i32_0 = arith.constant 0 : i32
    return %arg0, %c0_i32 : i32, i32
  }
  func.func @transform_1(%arg0: i32) -> (i32, i32) {
    %c0_i32 = arith.constant 0 : i32
    %c0_i32_0 = arith.constant 0 : i32
    %c0_i32_1 = arith.constant 0 : i32
    return %c0_i32, %c0_i32_0 : i32, i32
  }
  func.func @transform_2(%arg0: i32) -> (i32, i32) {
    %c0_i32 = arith.constant 0 : i32
    %c0_i32_0 = arith.constant 0 : i32
    return %arg0, %c0_i32 : i32, i32
  }
}

</mosaic_0001>

<bundles_post_ra>
// kernel: tpu_custom_call.1
= control target key start
LH: loop header
LB: loop body
LE: loop exit
PB: predicated region body
PF: predicated region fallthrough
CT: control target
= control target key end

     0   :  { %7 = vsyncpa [#allocation3], 0  ;;  %s261_s0 = inlined_call_operand.hbm [shape: f32[2,1024], index: 0, kind: input, shape index: {}]   ;;  %s262_s1 = inlined_call_operand.hbm [shape: f32[1,1024], index: 1, kind: input, shape index: {}]   ;;  %s263_s2 = inlined_call_operand.hbm [shape: f32[2,1024], index: 2, kind: output, shape index: {}]  }
   0x1   :  { %8 = vsyncpa [#allocation6], 0 }
   0x2   :  { %9 = vsyncpa [#allocation4], 0  ;;  %s15_s11 = sshll.u32 %s261_s0, 4  ;;  %s221_s12 = smov [#allocation2]   ;;  %s16_s11 = int_to_ptr.hbm [resolvable:$true] %s15_s11 }
   0x3   :  { %s17_s13 = sshll.u32 %s221_s12, 4  ;;  %s26_s16 = sshll.u32 %s262_s1, 4  ;;  %s18_s13 = int_to_ptr.vmem [resolvable:$true] %s17_s13  ;;  %s27_s16 = int_to_ptr.hbm [resolvable:$true] %s26_s16 }
   0x4   :  { %20 = dma.hbm_to_vmem [thread:$0]  %s16_s11, 256, %s18_s13, [#allocation3]  }
   0x5   :  { %s222_s17 = smov [#allocation5]  }
   0x6   :  { %s28_s18 = sshll.u32 %s222_s17, 4  ;;  %s29_s18 = int_to_ptr.vmem [resolvable:$true] %s28_s18 }
   0x7   :  { %31 = dma.hbm_to_vmem [thread:$0]  %s27_s16, 128, %s29_s18, [#allocation6]  }
   0x8   :  { %215 = dma.done.wait [#allocation3], 256  }
   0x9   :  { %216 = vsyncadd [#allocation3], 4294967040 }
   0xa   :  { %217 = dma.done.wait [#allocation6], 128  }
   0xb   :  { %218 = vsyncadd [#allocation6], 4294967168  ;;  %v42_v0 = vld [vmem:[#allocation5] sm:$0xff]  ;;  %vm58_vm0 = vcmask 1041408   ;;  %vm60_vm1 = vcmask 1045508   ;;  %vm62_vm2 = vcmask 1043456  }
   0xc   :  { %v44_v1 = vperm.slane %v42_v0, 0  ;;  %v45_v2 = vperm.slane %v42_v0, 1  ;;  %v46_v3 = vperm.slane %v42_v0, 2  ;;  %v47_v4 = vperm.slane %v42_v0, 3  ;;  %v40_v12 = vld [vmem:[#allocation2] sm:$0xff]  ;;  %v41_v16 = vld [vmem:[#allocation2 + $0x8] sm:$0xff] }
   0xd   :  { %v48_v5 = vperm.slane %v42_v0, 4  ;;  %v49_v6 = vperm.slane %v42_v0, 5  ;;  %v50_v7 = vperm.slane %v42_v0, 6  ;;  %v51_v8 = vperm.slane %v42_v0, 7  ;;  %s224_s0 = smov [#allocation7]   ;;  %s128_s21 = sshll.u32 %s263_s2, 4  ;;  %s129_s21 = int_to_ptr.hbm [resolvable:$true] %s128_s21 }
   0xe   :  { %v52_v9 = vrot.slane %v45_v2, 6  ;;  %v53_v10 = vrot.slane %v46_v3, 4  ;;  %v54_v11 = vrot.slane %v47_v4, 2  ;;  %v223_v48 = vmov 269488144   ;;  %s126_s1 = sshll.u32 %s224_s0, 4  ;;  %s127_s1 = int_to_ptr.vmem [resolvable:$true] %s126_s1 }
   0xf   :  { %v55_v13 = vrot.slane %v49_v6, 6  ;;  %v56_v14 = vrot.slane %v50_v7, 4  ;;  %v57_v15 = vrot.slane %v51_v8, 2  ;;  %v113_v49 = vunpack.c.l.s4 %v223_v48 }
  0x10   :  { %v59_v17 = vsel %vm58_vm0, %v44_v1, %v52_v9  ;;  %v61_v18 = vsel %vm60_vm1, %v53_v10, %v54_v11 }
  0x11   :  { %v63_v19 = vsel %vm62_vm2, %v59_v17, %v61_v18  ;;  %v64_v20 = vsel %vm58_vm0, %v48_v5, %v55_v13  ;;  %v65_v21 = vsel %vm60_vm1, %v56_v14, %v57_v15  ;;  %v114_v50 = vunpack.c.0.s8 %v113_v49 }
  0x12   :  { %v66_v22 = vsel %vm62_vm2, %v64_v20, %v65_v21  ;;  %v69_v23 = vmul.f32 %v63_v19, %v40_v12 }
  0x13   :  { %v70_v24 = vmul.f32 %v66_v22, %v41_v16 }
  0x14   :  { %73 = vst [vmem:[#allocation1] ss:$4 sm:$0xff] %v69_v23 }
  0x15   :  { %75 = vst [vmem:[#allocation1 + $0x20] ss:$4 sm:$0xff] %v70_v24 }
  0x1b   :  { %v76_v25 = vld.sshfl [vmem:[#allocation1] sm:$0xff pattern:$0x73625140]  ;;  %v77_v26 = vld.sshfl [vmem:[#allocation1 + $0x8] sm:$0xff pattern:$0x73625140] }
  0x1c   :  { %v78_v27 = vld.sshfl [vmem:[#allocation1 + $0x10] sm:$0xff pattern:$0x73625140]  ;;  %v79_v28 = vld.sshfl [vmem:[#allocation1 + $0x18] sm:$0xff pattern:$0x73625140] }
  0x1d   :  { %v92_v29 = vsel %vm58_vm0, %v76_v25, 0.0  ;;  %v93_v30 = vsel %vm58_vm0, %v77_v26, 0.0  ;;  %v95_v31 = vsel %vm58_vm0, %v78_v27, 0.0  ;;  %v80_v32 = vld.sshfl [vmem:[#allocation1 + $0x20] sm:$0xff pattern:$0x73625140] }
  0x1e   :  { %v94_v33 = vadd.f32 %v93_v30, %v92_v29  ;;  %v97_v34 = vsel %vm58_vm0, %v79_v28, 0.0  ;;  %v81_v35 = vld.sshfl [vmem:[#allocation1 + $0x28] sm:$0xff pattern:$0x73625140]  ;;  %v99_v37 = vsel %vm58_vm0, %v80_v32, 0.0 }
  0x1f   :  { %v82_v38 = vld.sshfl [vmem:[#allocation1 + $0x30] sm:$0xff pattern:$0x73625140]  ;;  %v101_v40 = vsel %vm58_vm0, %v81_v35, 0.0 }
  0x20   :  { %v96_v36 = vadd.f32 %v95_v31, %v94_v33  ;;  %v83_v41 = vld.sshfl [vmem:[#allocation1 + $0x38] sm:$0xff pattern:$0x73625140]  ;;  %v103_v43 = vsel %vm58_vm0, %v82_v38, 0.0 }
  0x21   :  { %v105_v45 = vsel %vm58_vm0, %v83_v41, 0.0 }
  0x22   :  { %v98_v39 = vadd.f32 %v97_v34, %v96_v36 }
  0x24   :  { %v100_v42 = vadd.f32 %v99_v37, %v98_v39 }
  0x26   :  { %v102_v44 = vadd.f32 %v101_v40, %v100_v42 }
  0x28   :  { %v104_v46 = vadd.f32 %v103_v43, %v102_v44 }
  0x2a   :  { %v106_v47 = vadd.f32 %v105_v45, %v104_v46 }
  0x2c   :  { %107 = vadd.xlane.f32.xlu0 %v106_v47 }
  0x9f   :  { %v108_v51 = vpop.xlane.xlu0 %107 }
  0xa0   :  { %v110_v52 = vmax.f32 %v108_v51, 0.0 }
  0xa2   :  { %v115_v53 = vperm.slane %v110_v52, %v114_v50 }
  0xa4   :  { %v117_v54 = vmul.f32 %v115_v53, %v40_v12  ;;  %v118_v55 = vmul.f32 %v115_v53, %v41_v16 }
  0xa6   :  { %119 = vst [vmem:[#allocation7] sm:$0xff] %v117_v54 }
  0xa7   :  { %120 = vst [vmem:[#allocation7 + $0x8] sm:$0xff] %v118_v55 }
  0xa8   :  { %131 = dma.vmem_to_hbm [thread:$0]  %s127_s1, 256, %s129_s21, [#allocation4]  }
  0xa9   :  { %219 = dma.done.wait [#allocation4], 256  }
  0xaa   :  { %220 = vsyncadd [#allocation4], 4294967040 }
  0xab   :  { %136 = vsyncpa [#allocation3], 1 }
  0xac   :  { %137 = vsyncpa [#allocation6], 1 }
  0xad   :  { %138 = vsyncpa [#allocation4], 1 }

</bundles_post_ra>
